<compile_context>
chip_gen: v7x
topology: tpu7x:2x2x1
jax: 0.10.0
libtpu: 0.0.40
codegen_flags: <defaults>
</compile_context>

<pallas_src>
import jax
import jax.numpy as jnp
from jax import lax
from jax.experimental import pallas as pl
from jax.experimental.pallas import tpu as pltpu


def _round_up(x, m):
    return ((x + m - 1) // m) * m


def _linear_kernel(x_ref, w_ref, b_ref, o_ref, acc_ref):
    # x_ref: (TM, TK)   w_ref: (N_pad, TK)   b_ref: (1, N_pad)
    # o_ref: (TM, N_pad)   acc_ref: (TM, N_pad) f32 scratch
    k = pl.program_id(1)

    @pl.when(k == 0)
    def _():
        acc_ref[...] = jnp.zeros_like(acc_ref)

    # x @ w.T without materializing a transposed weight copy.
    acc_ref[...] += lax.dot_general(
        x_ref[...], w_ref[...],
        dimension_numbers=(((1,), (1,)), ((), ())),
        preferred_element_type=jnp.float32)

    @pl.when(k == pl.num_programs(1) - 1)
    def _():
        o_ref[...] = (acc_ref[...] + b_ref[...]).astype(o_ref.dtype)


def _choose_tk(h):
    # Keep full H when it is small; otherwise pick the largest 128-multiple
    # divisor of H up to 1024 so K blocks tile H exactly.
    if h <= 1024:
        return h
    for tk in (1024, 512, 256, 128):
        if h % tk == 0:
            return tk
    return h  # irregular H: fall back to a single K block


def linear_classifier(hidden_states, weight, bias, *, block_m=512,
                      use_bf16=False):
    """hidden_states: [B, S, H]; weight: [N, H] (PyTorch layout); bias: [N]."""
    B, S, H = hidden_states.shape
    N = weight.shape[0]
    out_dtype = hidden_states.dtype

    M = B * S
    x = hidden_states.reshape(M, H)

    # Lane-dense output: pad num_labels up to a multiple of 128. Padded MXU
    # columns are free; the slice below removes them. (In a real model the
    # padded weight/bias would be prepared once at parameter-load time.)
    N_pad = _round_up(max(N, 128), 128)
    w = jnp.zeros((N_pad, H), weight.dtype).at[:N, :].set(weight)
    b = jnp.zeros((1, N_pad), jnp.float32).at[0, :N].set(
        bias.astype(jnp.float32))

    # Sublane constraint: M tile must be a multiple of 8.
    M_pad = _round_up(M, 8)
    if M_pad != M:
        x = jnp.zeros((M_pad, H), x.dtype).at[:M, :].set(x)

    if use_bf16:  # v6e / v7x: halve HBM bytes; accumulation stays f32.
        x = x.astype(jnp.bfloat16)
        w = w.astype(jnp.bfloat16)

    tm = min(block_m, M_pad)
    tk = _choose_tk(H)
    grid = (pl.cdiv(M_pad, tm), pl.cdiv(H, tk))

    flops = 2 * M_pad * H * N_pad
    bytes_accessed = (x.size * x.dtype.itemsize
                      + w.size * w.dtype.itemsize
                      + b.size * 4
                      + M_pad * N_pad * jnp.dtype(out_dtype).itemsize)

    out = pl.pallas_call(
        _linear_kernel,
        out_shape=jax.ShapeDtypeStruct((M_pad, N_pad), out_dtype),
        grid_spec=pltpu.PrefetchScalarGridSpec(
            num_scalar_prefetch=0,
            grid=grid,
            in_specs=[
                pl.BlockSpec((tm, tk), lambda i, k: (i, k)),        # x tile
                pl.BlockSpec((N_pad, tk), lambda i, k: (0, k)),     # weight
                pl.BlockSpec((1, N_pad), lambda i, k: (0, 0)),      # bias
            ],
            out_specs=pl.BlockSpec((tm, N_pad), lambda i, k: (i, 0)),
            scratch_shapes=[pltpu.VMEM((tm, N_pad), jnp.float32)],
        ),
        compiler_params=pltpu.CompilerParams(
            # M tiles are independent -> megacore-parallel; K is a reduction.
            dimension_semantics=("parallel", "arbitrary"),
        ),
        cost_estimate=pl.CostEstimate(
            flops=flops, transcendentals=0, bytes_accessed=bytes_accessed),
    )(x, w, b)

    return out[:M, :N].reshape(B, S, N)


if __name__ == "__main__":
    # Small shapes consistent with the module: hidden_size=32, num_labels=8.
    B, S, H, N = 2, 8, 32, 8

    key = jax.random.PRNGKey(0)
    k_x, k_w, k_b = jax.random.split(key, 3)

    hidden_states = jax.random.normal(k_x, (B, S, H), dtype=jnp.float32)
    # Deterministic parameter init (mimics nn.Linear's uniform init scale).
    bound = 1.0 / (H ** 0.5)
    weight = jax.random.uniform(k_w, (N, H), minval=-bound, maxval=bound,
                                dtype=jnp.float32)
    bias = jax.random.uniform(k_b, (N,), minval=-bound, maxval=bound,
                              dtype=jnp.float32)

    ref = hidden_states @ weight.T + bias

    # f32 path (exact vs reference).
    logits = linear_classifier(hidden_states, weight, bias)
    jax.block_until_ready(logits)
    assert logits.shape == (B, S, N)
    assert jnp.allclose(logits, ref, atol=1e-5, rtol=1e-5)

    # bf16 MXU-operand path (recommended on v6e/v7x): f32 accumulation,
    # looser tolerance due to input rounding only.
    logits_bf16 = linear_classifier(hidden_states, weight, bias,
                                    use_bf16=True)
    jax.block_until_ready(logits_bf16)
    assert logits_bf16.shape == (B, S, N)
    assert jnp.allclose(logits_bf16, ref, atol=5e-2, rtol=5e-2)

    print("KERNEL_OK")
</pallas_src>

<mosaic_0001>
module attributes {stable_mosaic.version = 11 : i64} {
  func.func @_linear_kernel(%arg0: i32, %arg1: i32, %arg2: memref<16x32xf32, #tpu.memory_space<vmem>>, %arg3: memref<128x32xf32, #tpu.memory_space<vmem>>, %arg4: memref<1x128xf32, #tpu.memory_space<vmem>>, %arg5: memref<16x128xf32, #tpu.memory_space<vmem>>, %arg6: memref<16x128xf32, #tpu.memory_space<vmem>>) attributes {dimension_semantics = [#tpu.dimension_semantics<parallel>, #tpu.dimension_semantics<arbitrary>], iteration_bounds = array<i64: 1, 1>, scalar_prefetch = 0 : i64, scratch_operands = 1 : i64, tpu.core_type = #tpu.core_type<tc>, window_params = [{transform_indices = @transform_0, window_bounds = array<i64: 16, 32>}, {transform_indices = @transform_1, window_bounds = array<i64: 128, 32>}, {pipeline_mode = #tpu.pipeline_mode<synchronous>, transform_indices = @transform_2, window_bounds = array<i64: 1, 128>}, {transform_indices = @transform_3, window_bounds = array<i64: 16, 128>}]} {
    %c0_i32 = arith.constant 0 : i32
    %0 = arith.cmpi eq, %arg1, %c0_i32 : i32
    %1 = arith.extui %0 : i1 to i32
    %c0_i32_0 = arith.constant 0 : i32
    %2 = arith.cmpi ne, %1, %c0_i32_0 : i32
    scf.if %2 {
      %cst_10 = arith.constant 0.000000e+00 : f32
      %12 = vector.broadcast %cst_10 : f32 to vector<16x128xf32>
      %c0_11 = arith.constant 0 : index
      %c0_12 = arith.constant 0 : index
      %13 = vector.load %arg6[%c0_11, %c0_12] : memref<16x128xf32, #tpu.memory_space<vmem>>, vector<16x128xf32>
      tpu.vector_store %arg6[%c0_11, %c0_12], %12 {strides = array<i32>} : memref<16x128xf32, #tpu.memory_space<vmem>>, vector<16x128xf32>,
    } else {
    }
    %c0 = arith.constant 0 : index
    %c0_1 = arith.constant 0 : index
    %3 = vector.load %arg6[%c0, %c0_1] : memref<16x128xf32, #tpu.memory_space<vmem>>, vector<16x128xf32>
    %c0_2 = arith.constant 0 : index
    %c0_3 = arith.constant 0 : index
    %4 = vector.load %arg2[%c0_2, %c0_3] : memref<16x32xf32, #tpu.memory_space<vmem>>, vector<16x32xf32>
    %c0_4 = arith.constant 0 : index
    %c0_5 = arith.constant 0 : index
    %5 = vector.load %arg3[%c0_4, %c0_5] : memref<128x32xf32, #tpu.memory_space<vmem>>, vector<128x32xf32>
    %cst = arith.constant dense<0.000000e+00> : vector<16x128xf32>
    %6 = tpu.matmul %4, %5, %cst {dimension_numbers = #tpu.dot_dimension_numbers<[1], [1], [0], [0], [0, 0, 1, 0], [], []>} : vector<16x32xf32>, vector<128x32xf32>, vector<16x128xf32> -> vector<16x128xf32>
    %7 = arith.addf %3, %6 : vector<16x128xf32>
    %c0_6 = arith.constant 0 : index
    %c0_7 = arith.constant 0 : index
    %8 = vector.load %arg6[%c0_6, %c0_7] : memref<16x128xf32, #tpu.memory_space<vmem>>, vector<16x128xf32>
    tpu.vector_store %arg6[%c0_6, %c0_7], %7 {strides = array<i32>} : memref<16x128xf32, #tpu.memory_space<vmem>>, vector<16x128xf32>,
    %c0_i32_8 = arith.constant 0 : i32
    %9 = arith.cmpi eq, %arg1, %c0_i32_8 : i32
    %10 = arith.extui %9 : i1 to i32
    %c0_i32_9 = arith.constant 0 : i32
    %11 = arith.cmpi ne, %10, %c0_i32_9 : i32
    scf.if %11 {
      %c0_10 = arith.constant 0 : index
      %c0_11 = arith.constant 0 : index
      %12 = vector.load %arg6[%c0_10, %c0_11] : memref<16x128xf32, #tpu.memory_space<vmem>>, vector<16x128xf32>
      %c0_12 = arith.constant 0 : index
      %c0_13 = arith.constant 0 : index
      %13 = vector.load %arg4[%c0_12, %c0_13] : memref<1x128xf32, #tpu.memory_space<vmem>>, vector<1x128xf32>
      %14 = vector.broadcast %13 : vector<1x128xf32> to vector<16x128xf32>
      %15 = arith.addf %12, %14 : vector<16x128xf32>
      %c0_14 = arith.constant 0 : index
      %c0_15 = arith.constant 0 : index
      %16 = vector.load %arg5[%c0_14, %c0_15] : memref<16x128xf32, #tpu.memory_space<vmem>>, vector<16x128xf32>
      tpu.vector_store %arg5[%c0_14, %c0_15], %15 {strides = array<i32>} : memref<16x128xf32, #tpu.memory_space<vmem>>, vector<16x128xf32>,
    } else {
    }
    return
  }
  func.func @transform_0(%arg0: i32, %arg1: i32) -> (i32, i32) {
    %c0_i32 = arith.constant 0 : i32
    return %arg0, %arg1 : i32, i32
  }
  func.func @transform_1(%arg0: i32, %arg1: i32) -> (i32, i32) {
    %c0_i32 = arith.constant 0 : i32
    %c0_i32_0 = arith.constant 0 : i32
    return %c0_i32, %arg1 : i32, i32
  }
  func.func @transform_2(%arg0: i32, %arg1: i32) -> (i32, i32) {
    %c0_i32 = arith.constant 0 : i32
    %c0_i32_0 = arith.constant 0 : i32
    %c0_i32_1 = arith.constant 0 : i32
    return %c0_i32, %c0_i32_0 : i32, i32
  }
  func.func @transform_3(%arg0: i32, %arg1: i32) -> (i32, i32) {
    %c0_i32 = arith.constant 0 : i32
    %c0_i32_0 = arith.constant 0 : i32
    return %arg0, %c0_i32 : i32, i32
  }
}

</mosaic_0001>

<bundles_post_ra>
// kernel: tpu_custom_call.1
= control target key start
LH: loop header
LB: loop body
LE: loop exit
PB: predicated region body
PF: predicated region fallthrough
CT: control target
= control target key end

     0   :  { %vm41_vm0 = vcmask 261120   ;;  %s486_s0 = inlined_call_operand.vmem [shape: f32[16,32], index: 0, kind: input, shape index: {}]   ;;  %s487_s1 = inlined_call_operand.vmem [shape: f32[128,32], index: 1, kind: input, shape index: {}]   ;;  %s488_s2 = inlined_call_operand.vmem [shape: f32[1,128], index: 2, kind: input, shape index: {}]   ;;  %s489_s3 = inlined_call_operand.hbm [shape: f32[16,128], index: 3, kind: output, shape index: {}]  }
   0x1   :  { %v25_v0 = vld [vmem:[%s487_s1] sm:$0xff]  ;;  %v26_v1 = vld [vmem:[%s487_s1 + $0x8] sm:$0xff]  ;;  %v27_v2 = vld [vmem:[%s487_s1 + $0x10] sm:$0xff] }
   0x2   :  { %v279_v3 = vpack.c.bf16 %v26_v1, %v25_v0  ;;  %vm388_vm1 = vmpackc.low %vm41_vm0, %vm41_vm0  ;;  %v28_v5 = vld [vmem:[%s487_s1 + $0x18] sm:$0xff]  ;;  %v23_v7 = vld [vmem:[%s486_s0] sm:$0xff] }
   0x3   :  { %v285_v6 = vpack.c.bf16 %v28_v5, %v27_v2  ;;  %v29_v8 = vld [vmem:[%s487_s1 + $0x20] sm:$0xff]  ;;  %v30_v9 = vld [vmem:[%s487_s1 + $0x28] sm:$0xff]  ;;  %276 = vmatprep.mubr.msk.f32.mxu0 %vm41_vm0, %v23_v7 }
   0x4   :  { %281 = vmatprep.subr.msk.bf16.mxu0 %vm388_vm1, %v279_v3 }
   0x5   :  { %284 = vmatpush3.bf16.xpose.msk.msra.mxu0 %vm388_vm1, %v279_v3 }
   0x6   :  { %287 = vmatprep.subr.msk.bf16.mxu0 %vm388_vm1, %v285_v6 }
   0x7   :  { %8 = vsyncpa [#allocation4], 0  ;;  %v291_v10 = vpack.c.bf16 %v30_v9, %v29_v8  ;;  %v31_v11 = vld [vmem:[%s487_s1 + $0x30] sm:$0xff]  ;;  %v32_v12 = vld [vmem:[%s487_s1 + $0x38] sm:$0xff] }
   0x8   :  { %v297_v13 = vpack.c.bf16 %v32_v12, %v31_v11  ;;  %v33_v14 = vld [vmem:[%s487_s1 + $0x40] sm:$0xff]  ;;  %v34_v15 = vld [vmem:[%s487_s1 + $0x48] sm:$0xff]  ;;  %v35_v17 = vld [vmem:[%s487_s1 + $0x50] sm:$0xff] }
   0x9   :  { %v303_v16 = vpack.c.bf16 %v34_v15, %v33_v14  ;;  %v36_v18 = vld [vmem:[%s487_s1 + $0x58] sm:$0xff]  ;;  %v37_v20 = vld [vmem:[%s487_s1 + $0x60] sm:$0xff]  ;;  %v38_v21 = vld [vmem:[%s487_s1 + $0x68] sm:$0xff] }
   0xa   :  { %v309_v19 = vpack.c.bf16 %v36_v18, %v35_v17  ;;  %v315_v22 = vpack.c.bf16 %v38_v21, %v37_v20  ;;  %v39_v23 = vld [vmem:[%s487_s1 + $0x70] sm:$0xff]  ;;  %v40_v24 = vld [vmem:[%s487_s1 + $0x78] sm:$0xff]  ;;  %v24_v26 = vld [vmem:[%s486_s0 + $0x8] sm:$0xff]  ;;  %s354_s1 = smov [#allocation3]  }
   0xb   :  { %v321_v25 = vpack.c.bf16 %v40_v24, %v39_v23  ;;  %v225_v27 = vld [vmem:[%s488_s2] ss:$0 sm:$0xff]  ;;  %s196_s23 = sshll.u32 %s354_s1, 4  ;;  %s197_s23 = int_to_ptr.vmem [resolvable:$true] %s196_s23 }
   0xc   :  { %s330_s24 = scalar_lea.vmem %s197_s23, 256  ;;  %p335_p1 = scmp.lt.s32.totalorder %s197_s23, %s197_s23 }
   0xd   :  { %290 = vmatpush3.bf16.xpose.msk.msra.mxu0 %vm388_vm1, %v285_v6  ;;  %p331_p0 = scmp.ne.s32.totalorder %s197_s23, %s330_s24  ;;  %p336_p2 = scmp.lt.s32.totalorder %s330_s24, %s330_s24 }
   0xe   :  { %293 = vmatprep.subr.msk.bf16.mxu0 %vm388_vm1, %v291_v10 }
   0xf   :  { %p337_p3 = por %p336_p2, %p335_p1 }
  0x11   :  { %p338_p4 = pnand %p337_p3, %p331_p0 }
  0x15   :  { %296 = vmatpush3.bf16.xpose.msk.msra.mxu0 %vm388_vm1, %v291_v10 }
  0x16   :  { %299 = vmatprep.subr.msk.bf16.mxu0 %vm388_vm1, %v297_v13 }
  0x1d   :  { %302 = vmatpush3.bf16.xpose.msk.msra.mxu0 %vm388_vm1, %v297_v13 }
  0x1e   :  { %305 = vmatprep.subr.msk.bf16.mxu0 %vm388_vm1, %v303_v16 }
  0x25   :  { %308 = vmatpush3.bf16.xpose.msk.msra.mxu0 %vm388_vm1, %v303_v16 }
  0x26   :  { %311 = vmatprep.subr.msk.bf16.mxu0 %vm388_vm1, %v309_v19 }
  0x2d   :  { %314 = vmatpush3.bf16.xpose.msk.msra.mxu0 %vm388_vm1, %v309_v19 }
  0x2e   :  { %317 = vmatprep.subr.msk.bf16.mxu0 %vm388_vm1, %v315_v22 }
  0x35   :  { %320 = vmatpush3.bf16.xpose.msk.msra.mxu0 %vm388_vm1, %v315_v22 }
  0x36   :  { %323 = vmatprep.subr.msk.bf16.mxu0 %vm388_vm1, %v321_v25 }
  0x3d   :  { %326 = vmatpush3.bf16.xpose.msk.msra.mxu0 %vm388_vm1, %v321_v25 }
  0x44   :  { %277 = vmatmul.mubr.msk.f32.vlgmr.msra.gmra.mrb[0].mxu0 %vm41_vm0, %v24_v26 }
 0x117   :  { %v278_v28 = vpop.f32.mrb[0].mxu0 }
 0x118   :  { %v188_v29 = vadd.f32 %v278_v28, %v225_v27  ;;  %v162_v30 = vpop.f32.mrb[1].mxu0 }
 0x119   :  { %v187_v31 = vadd.f32 %v225_v27, %v162_v30 }
 0x11a   :  { %190 = vst [vmem:[#allocation3 + $0x8] sm:$0xff] %v188_v29 }
 0x11b   :  { %189 = vst [vmem:[#allocation3] sm:$0xff] %v187_v31 }
 0x11c   :  { %341 = shalt.err (!%p338_p4)
}
 0x11d   :  { %s342_s2 = scalar_lea.hbm %s489_s3, 256 }
 0x11e   :  { %p343_p5 = scmp.ne.s32.totalorder %s489_s3, %s342_s2  ;;  %p346_p6 = scmp.lt.u32.totalorder %s342_s2, %s489_s3 }
 0x120   :  { %p348_p7 = pnand %p346_p6, %p343_p5 }
 0x122   :  { %351 = shalt.err (!%p348_p7)
}
 0x123   :  { %s355_s30 = smov 128   ;;  %s356_s4 = smov 8  }
 0x124   :  { %202 = dma.vmem_to_hbm [thread:$0]  %s197_s23, 256, %s489_s3, [#allocation4], %s355_s30, %s355_s30, %s356_s4  }
 0x125   :  { %352 = dma.done.wait [#allocation4], 256  }
 0x126   :  { %353 = vsyncadd [#allocation4], 4294967040 }
 0x127   :  { %206 = vsyncpa [#allocation4], 1 }

</bundles_post_ra>
